<compile_context>
chip_gen: v6e
topology: v6e:2x2x1
jax: 0.10.0
libtpu: 0.0.40
codegen_flags: <defaults>
</compile_context>

<pallas_src>
import math

import jax
import jax.numpy as jnp
from jax.experimental import pallas as pl
from jax.experimental.pallas import tpu as pltpu

# ----- "config" (small, consistent with the module's shapes) -----
BATCH = 2
SEQ = 8
HIDDEN = 32
HEADS = 4
HEAD_DIM = HIDDEN // HEADS
INTER = 64          # intermediate_size
LN_EPS = 1e-12      # layer_norm_eps


def _layer_norm(x, gamma, beta, eps):
    mean = jnp.mean(x, axis=-1, keepdims=True)
    var = jnp.mean((x - mean) ** 2, axis=-1, keepdims=True)
    return (x - mean) * jax.lax.rsqrt(var + eps) * gamma + beta


def elasticbert_layer_kernel(x_ref, wa_ref, wb_ref, vecs_ref, aux_ref, out_ref):
    H, I = HIDDEN, INTER
    BS = BATCH * SEQ

    x = x_ref[...]                       # (16, 32)
    vecs = vecs_ref[...]                 # (16, 128) packed small vectors/masks

    # Weight tiles: all slices at lane offsets 0 / 128 (whole-vreg selection).
    w_qkv = wa_ref[:, 0:128]             # (32, 128)  [Wq|Wk|Wv|0]
    w_i = wa_ref[:, 128:128 + I]         # (32, 64)
    w_ao = wb_ref[0:128, :]              # (128, 32)  real Wao at rows 64..95
    w_o = wb_ref[128:128 + I, :]         # (64, 32)

    b_qkv = vecs[0:1, :]                 # (1, 128)   [bq|bk|bv|0]
    b_ao = vecs[1:2, 0:H]
    ln1_g = vecs[2:3, 0:H]
    ln1_b = vecs[3:4, 0:H]
    b_i = vecs[4:5, 0:I]
    b_o = vecs[5:6, 0:H]
    ln2_g = vecs[6:7, 0:H]
    ln2_b = vecs[7:8, 0:H]
    o_hmask = vecs[8:8 + HEADS, :]       # (4, 128) per-head output-lane masks

    q_hmask = aux_ref[:, 0:H]            # (64, 32) head masks * 1/sqrt(d)
    smask = aux_ref[:, 128:128 + BS]     # (64, 16) additive score mask

    # --- fused Q/K/V projection: one MXU push ---
    qkv = jnp.dot(x, w_qkv, preferred_element_type=jnp.float32) + b_qkv  # (16,128)

    q2 = qkv[:, 0:H]                     # offset-0 lane slice (free)
    k2 = qkv[:, H:2 * H]                 # single sub-vreg lane slice (K only);
                                         # V is consumed in place (lanes 64..95)

    # Stack the 4 head-masked Q copies along the sublane axis: (64, 32).
    qm = jnp.concatenate([q2] * HEADS, axis=0) * q_hmask

    # ONE scores matmul for all heads & batches (contract hidden dims).
    s = jax.lax.dot_general(qm, k2, (((1,), (1,)), ((), ())),
                            preferred_element_type=jnp.float32)          # (64,16)
    s = s + smask                        # user mask + cross-batch -1e9 blocks
    s = s - jnp.max(s, axis=-1, keepdims=True)
    e = jnp.exp(s)
    p = e / jnp.sum(e, axis=-1, keepdims=True)   # exact softmax (no approx recip)

    # ONE context matmul; V stays in place at lanes 64..95 of the qkv tile.
    ctx_stk = jnp.dot(p, qkv, preferred_element_type=jnp.float32)        # (64,128)

    # Merge heads: each head's block contributes only its own output lanes.
    ctx = ctx_stk[0:BS] * o_hmask[0:1]
    for h in range(1, HEADS):
        ctx = ctx + ctx_stk[h * BS:(h + 1) * BS] * o_hmask[h:h + 1]      # (16,128)

    # --- ElasticBertSelfOutput: dense (row-padded Wao) + residual + LN ---
    attn = jnp.dot(ctx, w_ao, preferred_element_type=jnp.float32) + b_ao
    attn = _layer_norm(attn + x, ln1_g, ln1_b, LN_EPS)

    # --- ElasticBertIntermediate: dense + GELU (tanh form -> EUP) ---
    inter = jnp.dot(attn, w_i, preferred_element_type=jnp.float32) + b_i
    inter = jax.nn.gelu(inter, approximate=True)

    # --- ElasticBertOutput: dense + residual + LN ---
    ffn = jnp.dot(inter, w_o, preferred_element_type=jnp.float32) + b_o
    y = _layer_norm(ffn + attn, ln2_g, ln2_b, LN_EPS)

    out_ref[...] = y.astype(out_ref.dtype)


def _pack_inputs(attention_mask, p):
    """Wrapper-side (free XLA) packing of weights, vectors and masks."""
    H, I = HIDDEN, INTER
    f32 = jnp.float32

    # Weight tile A (32, 192): [Wq|Wk|Wv|pad] at lanes 0..127, Wi at 128..191.
    wa = jnp.zeros((H, 192), f32)
    wa = wa.at[:, 0:H].set(p["qw"])
    wa = wa.at[:, H:2 * H].set(p["kw"])
    wa = wa.at[:, 2 * H:3 * H].set(p["vw"])
    wa = wa.at[:, 128:128 + I].set(p["iw"])

    # Weight tile B (192, 32): rows 64..95 = Wao (aligned with V's lanes in the
    # context tile), rows 128..191 = Wo.
    wb = jnp.zeros((192, H), f32)
    wb = wb.at[2 * H:3 * H, :].set(p["aow"])
    wb = wb.at[128:128 + I, :].set(p["ow"])

    # vecs (16, 128): biases / LN params / per-head output-lane masks.
    vecs = jnp.zeros((16, 128), f32)
    vecs = vecs.at[0, 0:H].set(p["qb"][0])
    vecs = vecs.at[0, H:2 * H].set(p["kb"][0])
    vecs = vecs.at[0, 2 * H:3 * H].set(p["vb"][0])
    vecs = vecs.at[1, 0:H].set(p["aob"][0])
    vecs = vecs.at[2, 0:H].set(p["ln1g"][0])
    vecs = vecs.at[3, 0:H].set(p["ln1b"][0])
    vecs = vecs.at[4, 0:I].set(p["ib"][0])
    vecs = vecs.at[5, 0:H].set(p["ob"][0])
    vecs = vecs.at[6, 0:H].set(p["ln2g"][0])
    vecs = vecs.at[7, 0:H].set(p["ln2b"][0])
    lanes = jnp.arange(128)
    for h in range(HEADS):
        lo, hi = 2 * H + h * HEAD_DIM, 2 * H + (h + 1) * HEAD_DIM
        vecs = vecs.at[8 + h, :].set(((lanes >= lo) & (lanes < hi)).astype(f32))

    # aux (64, 256): lanes 0..31 = stacked head masks for Q (scaled by
    # 1/sqrt(d)); lanes 128..143 = additive score mask for the flattened
    # (head, batch*seq) x (batch*seq) layout (user mask + cross-batch -1e9).
    BS = BATCH * SEQ
    aux = jnp.zeros((HEADS * BS, 256), f32)
    rows = jnp.arange(HEADS * BS)
    head = rows // BS
    lane32 = jnp.arange(H)
    qmask = ((lane32[None, :] >= head[:, None] * HEAD_DIM) &
             (lane32[None, :] < (head[:, None] + 1) * HEAD_DIM)).astype(f32)
    aux = aux.at[:, 0:H].set(qmask * (1.0 / math.sqrt(HEAD_DIM)))

    rq = jnp.arange(BS)
    rk = jnp.arange(BS)
    bq, bk, sk = rq // SEQ, rk // SEQ, rk % SEQ
    user = attention_mask[:, 0, :]                               # (B, S)
    m16 = jnp.where(bq[:, None] == bk[None, :],
                    user[bq[:, None], sk[None, :]],
                    jnp.float32(-1e9))                           # (16, 16)
    aux = aux.at[:, 128:128 + BS].set(jnp.tile(m16, (HEADS, 1)))
    return wa, wb, vecs, aux


def elasticbert_layer(hidden_states, attention_mask, params):
    """hidden_states: (B, S, H) f32; attention_mask: (B, 1, S) additive f32."""
    B, S, H = hidden_states.shape
    assert (B, S, H) == (BATCH, SEQ, HIDDEN)

    x2 = hidden_states.reshape(B * S, H)
    wa, wb, vecs, aux = _pack_inputs(attention_mask, params)

    vmem = pltpu.MemorySpace.VMEM
    out2 = pl.pallas_call(
        elasticbert_layer_kernel,
        out_shape=jax.ShapeDtypeStruct((B * S, H), jnp.float32),
        in_specs=[pl.BlockSpec(memory_space=vmem)] * 5,
        out_specs=pl.BlockSpec(memory_space=vmem),
    )(x2, wa, wb, vecs, aux)
    return out2.reshape(B, S, H)


# ------------------- pure-JAX reference (for sanity check) -------------------
def reference_layer(x, mask, p):
    B, S, H = x.shape
    q = x @ p["qw"] + p["qb"]
    k = x @ p["kw"] + p["kb"]
    v = x @ p["vw"] + p["vb"]

    def split(t):
        return t.reshape(B, S, HEADS, HEAD_DIM).transpose(0, 2, 1, 3)

    qh, kh, vh = split(q), split(k), split(v)
    scores = jnp.einsum("bhld,bhrd->bhlr", qh, kh) / math.sqrt(HEAD_DIM)
    scores = scores + mask[:, :, None, :]        # (B,1,1,S) broadcast
    probs = jax.nn.softmax(scores, axis=-1)
    ctx = jnp.einsum("bhlr,bhrd->bhld", probs, vh)
    ctx = ctx.transpose(0, 2, 1, 3).reshape(B, S, H)

    attn = ctx @ p["aow"] + p["aob"]
    attn = _layer_norm(attn + x, p["ln1g"], p["ln1b"], LN_EPS)

    inter = jax.nn.gelu(attn @ p["iw"] + p["ib"], approximate=False)
    ffn = inter @ p["ow"] + p["ob"]
    return _layer_norm(ffn + attn, p["ln2g"], p["ln2b"], LN_EPS)


def make_params(key):
    ks = jax.random.split(key, 12)
    std = 0.02

    def w(k, shape):
        return jax.random.normal(k, shape, jnp.float32) * std

    return {
        # linear weights stored as (in, out)  (== PyTorch W.T)
        "qw": w(ks[0], (HIDDEN, HIDDEN)),  "qb": w(ks[1], (1, HIDDEN)),
        "kw": w(ks[2], (HIDDEN, HIDDEN)),  "kb": w(ks[3], (1, HIDDEN)),
        "vw": w(ks[4], (HIDDEN, HIDDEN)),  "vb": w(ks[5], (1, HIDDEN)),
        "aow": w(ks[6], (HIDDEN, HIDDEN)), "aob": w(ks[7], (1, HIDDEN)),
        "iw": w(ks[8], (HIDDEN, INTER)),   "ib": w(ks[9], (1, INTER)),
        "ow": w(ks[10], (INTER, HIDDEN)),  "ob": w(ks[11], (1, HIDDEN)),
        "ln1g": jnp.ones((1, HIDDEN), jnp.float32),
        "ln1b": jnp.zeros((1, HIDDEN), jnp.float32),
        "ln2g": jnp.ones((1, HIDDEN), jnp.float32),
        "ln2b": jnp.zeros((1, HIDDEN), jnp.float32),
    }


if __name__ == "__main__":
    key = jax.random.PRNGKey(0)
    k_x, k_p = jax.random.split(key)

    hidden_states = jax.random.normal(k_x, (BATCH, SEQ, HIDDEN), jnp.float32)

    # Additive attention mask (HuggingFace-style extended mask): 0 for keep,
    # -10000 for masked keys.  Batch 1 has its last 2 positions masked.
    mask = jnp.zeros((BATCH, 1, SEQ), jnp.float32)
    mask = mask.at[1, 0, SEQ - 2:].set(-10000.0)

    params = make_params(k_p)

    out = elasticbert_layer(hidden_states, mask, params)
    out = jax.block_until_ready(out)

    ref = reference_layer(hidden_states, mask, params)
    assert out.shape == (BATCH, SEQ, HIDDEN)
    # Softmax is exact again; the only approximation left is the tanh GELU
    # (vs. erf in the reference), which at these activation magnitudes
    # contributes ~1e-5.  Tolerance kept with generous margin.
    assert jnp.allclose(out, ref, atol=2e-3, rtol=2e-3), (
        f"max abs diff {jnp.max(jnp.abs(out - ref))}")

    print("KERNEL_OK")
</pallas_src>

<mosaic_0001>
module attributes {stable_mosaic.version = 11 : i64} {
  func.func @elasticbert_layer_kernel(%arg0: memref<16x32xf32, #tpu.memory_space<vmem>>, %arg1: memref<32x192xf32, #tpu.memory_space<vmem>>, %arg2: memref<192x32xf32, #tpu.memory_space<vmem>>, %arg3: memref<16x128xf32, #tpu.memory_space<vmem>>, %arg4: memref<64x256xf32, #tpu.memory_space<vmem>>, %arg5: memref<16x32xf32, #tpu.memory_space<vmem>>) attributes {dimension_semantics = [], scalar_prefetch = 0 : i64, scratch_operands = 0 : i64, tpu.core_type = #tpu.core_type<tc>} {
    %c0 = arith.constant 0 : index
    %c0_0 = arith.constant 0 : index
    %0 = vector.load %arg0[%c0, %c0_0] : memref<16x32xf32, #tpu.memory_space<vmem>>, vector<16x32xf32>
    %c0_1 = arith.constant 0 : index
    %c0_2 = arith.constant 0 : index
    %1 = vector.load %arg3[%c0_1, %c0_2] : memref<16x128xf32, #tpu.memory_space<vmem>>, vector<16x128xf32>
    %c0_3 = arith.constant 0 : index
    %c0_4 = arith.constant 0 : index
    %2 = vector.load %arg1[%c0_3, %c0_4] : memref<32x192xf32, #tpu.memory_space<vmem>>, vector<32x128xf32>
    %c0_5 = arith.constant 0 : index
    %c128 = arith.constant 128 : index
    %3 = vector.load %arg1[%c0_5, %c128] : memref<32x192xf32, #tpu.memory_space<vmem>>, vector<32x64xf32>
    %c0_6 = arith.constant 0 : index
    %c0_7 = arith.constant 0 : index
    %4 = vector.load %arg2[%c0_6, %c0_7] : memref<192x32xf32, #tpu.memory_space<vmem>>, vector<128x32xf32>
    %c128_8 = arith.constant 128 : index
    %c0_9 = arith.constant 0 : index
    %5 = vector.load %arg2[%c128_8, %c0_9] : memref<192x32xf32, #tpu.memory_space<vmem>>, vector<64x32xf32>
    %6 = vector.extract_strided_slice %1 {offsets = [0, 0], sizes = [1, 128], strides = [1, 1]} : vector<16x128xf32> to vector<1x128xf32>
    %7 = vector.extract_strided_slice %1 {offsets = [1, 0], sizes = [1, 32], strides = [1, 1]} : vector<16x128xf32> to vector<1x32xf32>
    %8 = vector.extract_strided_slice %1 {offsets = [2, 0], sizes = [1, 32], strides = [1, 1]} : vector<16x128xf32> to vector<1x32xf32>
    %9 = vector.extract_strided_slice %1 {offsets = [3, 0], sizes = [1, 32], strides = [1, 1]} : vector<16x128xf32> to vector<1x32xf32>
    %10 = vector.extract_strided_slice %1 {offsets = [4, 0], sizes = [1, 64], strides = [1, 1]} : vector<16x128xf32> to vector<1x64xf32>
    %11 = vector.extract_strided_slice %1 {offsets = [5, 0], sizes = [1, 32], strides = [1, 1]} : vector<16x128xf32> to vector<1x32xf32>
    %12 = vector.extract_strided_slice %1 {offsets = [6, 0], sizes = [1, 32], strides = [1, 1]} : vector<16x128xf32> to vector<1x32xf32>
    %13 = vector.extract_strided_slice %1 {offsets = [7, 0], sizes = [1, 32], strides = [1, 1]} : vector<16x128xf32> to vector<1x32xf32>
    %14 = vector.extract_strided_slice %1 {offsets = [8, 0], sizes = [4, 128], strides = [1, 1]} : vector<16x128xf32> to vector<4x128xf32>
    %c0_10 = arith.constant 0 : index
    %c0_11 = arith.constant 0 : index
    %15 = vector.load %arg4[%c0_10, %c0_11] : memref<64x256xf32, #tpu.memory_space<vmem>>, vector<64x32xf32>
    %c0_12 = arith.constant 0 : index
    %c128_13 = arith.constant 128 : index
    %16 = vector.load %arg4[%c0_12, %c128_13] : memref<64x256xf32, #tpu.memory_space<vmem>>, vector<64x16xf32>
    %cst = arith.constant dense<0.000000e+00> : vector<16x128xf32>
    %17 = tpu.matmul %0, %2, %cst {dimension_numbers = #tpu.dot_dimension_numbers<[1], [0], [0], [1], [0, 0, 1, 1], [], []>} : vector<16x32xf32>, vector<32x128xf32>, vector<16x128xf32> -> vector<16x128xf32>
    %18 = vector.broadcast %6 : vector<1x128xf32> to vector<16x128xf32>
    %19 = arith.addf %17, %18 : vector<16x128xf32>
    %20 = vector.extract_strided_slice %19 {offsets = [0, 0], sizes = [16, 32], strides = [1, 1]} : vector<16x128xf32> to vector<16x32xf32>
    %21 = vector.extract_strided_slice %19 {offsets = [0, 32], sizes = [16, 32], strides = [1, 1]} : vector<16x128xf32> to vector<16x32xf32>
    %22 = tpu.concatenate %20, %20, %20, %20 in 0 : vector<16x32xf32>, vector<16x32xf32>, vector<16x32xf32>, vector<16x32xf32> -> vector<64x32xf32>
    %23 = arith.mulf %22, %15 : vector<64x32xf32>
    %cst_14 = arith.constant dense<0.000000e+00> : vector<64x16xf32>
    %24 = tpu.matmul %23, %21, %cst_14 {dimension_numbers = #tpu.dot_dimension_numbers<[1], [1], [0], [0], [0, 0, 1, 0], [], []>} : vector<64x32xf32>, vector<16x32xf32>, vector<64x16xf32> -> vector<64x16xf32>
    %25 = arith.addf %24, %16 : vector<64x16xf32>
    %cst_15 = arith.constant dense<0xFF800000> : vector<64xf32>
    %26 = vector.multi_reduction <maximumf>, %25, %cst_15 [1] : vector<64x16xf32> to vector<64xf32>
    %27 = vector.shape_cast %26 : vector<64xf32> to vector<64x1xf32>
    %28 = vector.broadcast %27 : vector<64x1xf32> to vector<64x16xf32>
    %29 = arith.subf %25, %28 : vector<64x16xf32>
    %30 = math.exp %29 : vector<64x16xf32>
    %cst_16 = arith.constant dense<0.000000e+00> : vector<64xf32>
    %31 = vector.multi_reduction <add>, %30, %cst_16 [1] : vector<64x16xf32> to vector<64xf32>
    %32 = vector.shape_cast %31 : vector<64xf32> to vector<64x1xf32>
    %33 = vector.broadcast %32 : vector<64x1xf32> to vector<64x16xf32>
    %34 = arith.divf %30, %33 : vector<64x16xf32>
    %cst_17 = arith.constant dense<0.000000e+00> : vector<64x128xf32>
    %35 = tpu.matmul %34, %19, %cst_17 {dimension_numbers = #tpu.dot_dimension_numbers<[1], [0], [0], [1], [0, 0, 1, 1], [], []>} : vector<64x16xf32>, vector<16x128xf32>, vector<64x128xf32> -> vector<64x128xf32>
    %36 = vector.extract_strided_slice %35 {offsets = [0, 0], sizes = [16, 128], strides = [1, 1]} : vector<64x128xf32> to vector<16x128xf32>
    %37 = vector.extract_strided_slice %14 {offsets = [0, 0], sizes = [1, 128], strides = [1, 1]} : vector<4x128xf32> to vector<1x128xf32>
    %38 = vector.broadcast %37 : vector<1x128xf32> to vector<16x128xf32>
    %39 = arith.mulf %36, %38 : vector<16x128xf32>
    %40 = vector.extract_strided_slice %35 {offsets = [16, 0], sizes = [16, 128], strides = [1, 1]} : vector<64x128xf32> to vector<16x128xf32>
    %41 = vector.extract_strided_slice %14 {offsets = [1, 0], sizes = [1, 128], strides = [1, 1]} : vector<4x128xf32> to vector<1x128xf32>
    %42 = vector.broadcast %41 : vector<1x128xf32> to vector<16x128xf32>
    %43 = arith.mulf %40, %42 : vector<16x128xf32>
    %44 = arith.addf %39, %43 : vector<16x128xf32>
    %45 = vector.extract_strided_slice %35 {offsets = [32, 0], sizes = [16, 128], strides = [1, 1]} : vector<64x128xf32> to vector<16x128xf32>
    %46 = vector.extract_strided_slice %14 {offsets = [2, 0], sizes = [1, 128], strides = [1, 1]} : vector<4x128xf32> to vector<1x128xf32>
    %47 = vector.broadcast %46 : vector<1x128xf32> to vector<16x128xf32>
    %48 = arith.mulf %45, %47 : vector<16x128xf32>
    %49 = arith.addf %44, %48 : vector<16x128xf32>
    %50 = vector.extract_strided_slice %35 {offsets = [48, 0], sizes = [16, 128], strides = [1, 1]} : vector<64x128xf32> to vector<16x128xf32>
    %51 = vector.extract_strided_slice %14 {offsets = [3, 0], sizes = [1, 128], strides = [1, 1]} : vector<4x128xf32> to vector<1x128xf32>
    %52 = vector.broadcast %51 : vector<1x128xf32> to vector<16x128xf32>
    %53 = arith.mulf %50, %52 : vector<16x128xf32>
    %54 = arith.addf %49, %53 : vector<16x128xf32>
    %cst_18 = arith.constant dense<0.000000e+00> : vector<16x32xf32>
    %55 = tpu.matmul %54, %4, %cst_18 {dimension_numbers = #tpu.dot_dimension_numbers<[1], [0], [0], [1], [0, 0, 1, 1], [], []>} : vector<16x128xf32>, vector<128x32xf32>, vector<16x32xf32> -> vector<16x32xf32>
    %56 = vector.broadcast %7 : vector<1x32xf32> to vector<16x32xf32>
    %57 = arith.addf %55, %56 : vector<16x32xf32>
    %58 = arith.addf %57, %0 : vector<16x32xf32>
    %cst_19 = arith.constant dense<0.000000e+00> : vector<16xf32>
    %59 = vector.multi_reduction <add>, %58, %cst_19 [1] : vector<16x32xf32> to vector<16xf32>
    %60 = vector.shape_cast %59 : vector<16xf32> to vector<16x1xf32>
    %cst_20 = arith.constant 3.200000e+01 : f32
    %61 = vector.broadcast %cst_20 : f32 to vector<16x1xf32>
    %62 = arith.divf %60, %61 : vector<16x1xf32>
    %63 = vector.broadcast %62 : vector<16x1xf32> to vector<16x32xf32>
    %64 = arith.subf %58, %63 : vector<16x32xf32>
    %65 = arith.mulf %64, %64 : vector<16x32xf32>
    %cst_21 = arith.constant dense<0.000000e+00> : vector<16xf32>
    %66 = vector.multi_reduction <add>, %65, %cst_21 [1] : vector<16x32xf32> to vector<16xf32>
    %67 = vector.shape_cast %66 : vector<16xf32> to vector<16x1xf32>
    %cst_22 = arith.constant 3.200000e+01 : f32
    %68 = vector.broadcast %cst_22 : f32 to vector<16x1xf32>
    %69 = arith.divf %67, %68 : vector<16x1xf32>
    %70 = vector.broadcast %62 : vector<16x1xf32> to vector<16x32xf32>
    %71 = arith.subf %58, %70 : vector<16x32xf32>
    %cst_23 = arith.constant 9.99999996E-13 : f32
    %72 = vector.broadcast %cst_23 : f32 to vector<16x1xf32>
    %73 = arith.addf %69, %72 : vector<16x1xf32>
    %74 = math.rsqrt %73 : vector<16x1xf32>
    %75 = vector.broadcast %74 : vector<16x1xf32> to vector<16x32xf32>
    %76 = arith.mulf %71, %75 : vector<16x32xf32>
    %77 = vector.broadcast %8 : vector<1x32xf32> to vector<16x32xf32>
    %78 = arith.mulf %76, %77 : vector<16x32xf32>
    %79 = vector.broadcast %9 : vector<1x32xf32> to vector<16x32xf32>
    %80 = arith.addf %78, %79 : vector<16x32xf32>
    %cst_24 = arith.constant dense<0.000000e+00> : vector<16x64xf32>
    %81 = tpu.matmul %80, %3, %cst_24 {dimension_numbers = #tpu.dot_dimension_numbers<[1], [0], [0], [1], [0, 0, 1, 1], [], []>} : vector<16x32xf32>, vector<32x64xf32>, vector<16x64xf32> -> vector<16x64xf32>
    %82 = vector.broadcast %10 : vector<1x64xf32> to vector<16x64xf32>
    %83 = arith.addf %81, %82 : vector<16x64xf32>
    %84 = arith.mulf %83, %83 : vector<16x64xf32>
    %85 = arith.mulf %83, %84 : vector<16x64xf32>
    %cst_25 = arith.constant 4.471500e-02 : f32
    %86 = vector.broadcast %cst_25 : f32 to vector<16x64xf32>
    %87 = arith.mulf %86, %85 : vector<16x64xf32>
    %88 = arith.addf %83, %87 : vector<16x64xf32>
    %cst_26 = arith.constant 0.797884583 : f32
    %89 = vector.broadcast %cst_26 : f32 to vector<16x64xf32>
    %90 = arith.mulf %89, %88 : vector<16x64xf32>
    %91 = math.tanh %90 : vector<16x64xf32>
    %cst_27 = arith.constant 1.000000e+00 : f32
    %92 = vector.broadcast %cst_27 : f32 to vector<16x64xf32>
    %93 = arith.addf %92, %91 : vector<16x64xf32>
    %cst_28 = arith.constant 5.000000e-01 : f32
    %94 = vector.broadcast %cst_28 : f32 to vector<16x64xf32>
    %95 = arith.mulf %94, %93 : vector<16x64xf32>
    %96 = arith.mulf %83, %95 : vector<16x64xf32>
    %cst_29 = arith.constant dense<0.000000e+00> : vector<16x32xf32>
    %97 = tpu.matmul %96, %5, %cst_29 {dimension_numbers = #tpu.dot_dimension_numbers<[1], [0], [0], [1], [0, 0, 1, 1], [], []>} : vector<16x64xf32>, vector<64x32xf32>, vector<16x32xf32> -> vector<16x32xf32>
    %98 = vector.broadcast %11 : vector<1x32xf32> to vector<16x32xf32>
    %99 = arith.addf %97, %98 : vector<16x32xf32>
    %100 = arith.addf %99, %80 : vector<16x32xf32>
    %cst_30 = arith.constant dense<0.000000e+00> : vector<16xf32>
    %101 = vector.multi_reduction <add>, %100, %cst_30 [1] : vector<16x32xf32> to vector<16xf32>
    %102 = vector.shape_cast %101 : vector<16xf32> to vector<16x1xf32>
    %cst_31 = arith.constant 3.200000e+01 : f32
    %103 = vector.broadcast %cst_31 : f32 to vector<16x1xf32>
    %104 = arith.divf %102, %103 : vector<16x1xf32>
    %105 = vector.broadcast %104 : vector<16x1xf32> to vector<16x32xf32>
    %106 = arith.subf %100, %105 : vector<16x32xf32>
    %107 = arith.mulf %106, %106 : vector<16x32xf32>
    %cst_32 = arith.constant dense<0.000000e+00> : vector<16xf32>
    %108 = vector.multi_reduction <add>, %107, %cst_32 [1] : vector<16x32xf32> to vector<16xf32>
    %109 = vector.shape_cast %108 : vector<16xf32> to vector<16x1xf32>
    %cst_33 = arith.constant 3.200000e+01 : f32
    %110 = vector.broadcast %cst_33 : f32 to vector<16x1xf32>
    %111 = arith.divf %109, %110 : vector<16x1xf32>
    %112 = vector.broadcast %104 : vector<16x1xf32> to vector<16x32xf32>
    %113 = arith.subf %100, %112 : vector<16x32xf32>
    %cst_34 = arith.constant 9.99999996E-13 : f32
    %114 = vector.broadcast %cst_34 : f32 to vector<16x1xf32>
    %115 = arith.addf %111, %114 : vector<16x1xf32>
    %116 = math.rsqrt %115 : vector<16x1xf32>
    %117 = vector.broadcast %116 : vector<16x1xf32> to vector<16x32xf32>
    %118 = arith.mulf %113, %117 : vector<16x32xf32>
    %119 = vector.broadcast %12 : vector<1x32xf32> to vector<16x32xf32>
    %120 = arith.mulf %118, %119 : vector<16x32xf32>
    %121 = vector.broadcast %13 : vector<1x32xf32> to vector<16x32xf32>
    %122 = arith.addf %120, %121 : vector<16x32xf32>
    %c0_35 = arith.constant 0 : index
    %c0_36 = arith.constant 0 : index
    %123 = vector.load %arg5[%c0_35, %c0_36] : memref<16x32xf32, #tpu.memory_space<vmem>>, vector<16x32xf32>
    tpu.vector_store %arg5[%c0_35, %c0_36], %122 {strides = array<i32>} : memref<16x32xf32, #tpu.memory_space<vmem>>, vector<16x32xf32>,
    return
  }
}

</mosaic_0001>

<bundles_post_ra>
// kernel: tpu_custom_call.1
= control target key start
LH: loop header
LB: loop body
LE: loop exit
PB: predicated region body
PF: predicated region fallthrough
CT: control target
= control target key end

     0   :  { %vm77_vm0 = vcmask 261120   ;;  %s1474_s0 = inlined_call_operand.vmem [shape: f32[16,32], index: 0, kind: input, shape index: {}]   ;;  %s1475_s1 = inlined_call_operand.vmem [shape: f32[32,192], index: 1, kind: input, shape index: {}]   ;;  %s1476_s2 = inlined_call_operand.vmem [shape: f32[192,32], index: 2, kind: input, shape index: {}]   ;;  %s1477_s3 = inlined_call_operand.vmem [shape: f32[16,128], index: 3, kind: input, shape index: {}]   ;;  %s1478_s4 = inlined_call_operand.vmem [shape: f32[64,256], index: 4, kind: input, shape index: {}]   ;;  %s1479_s5 = inlined_call_operand.hbm [shape: f32[16,32], index: 5, kind: output, shape index: {}]  }
   0x1   :  { %v28_v0 = vld [vmem:[%s1475_s1 + $0x30] sm:$0xff]  ;;  %v27_v1 = vld [vmem:[%s1475_s1 + $0x20] sm:$0xff] }
   0x2   :  { %1005 = vmatprep.subr.mxu0 %v28_v0  ;;  %v1226_v2 = vld [vmem:[%s1474_s0] sm:$0xff]  ;;  %v26_v3 = vld [vmem:[%s1475_s1 + $0x10] sm:$0xff] }
   0x3   :  { %1006 = vmatpush3.msra.mxu0 %v28_v0  ;;  %1013 = vmatprep.mubr.msk.f32.mxu0 %vm77_vm0, %v1226_v2 }
   0x4   :  { %10 = vsyncpa [#allocation3], 0  ;;  %1007 = vmatprep.subr.mxu0 %v27_v1  ;;  %v25_v4 = vld [vmem:[%s1475_s1] sm:$0xff]  ;;  %v1239_v5 = vld [vmem:[%s1474_s0 + $0x8] sm:$0xff]  ;;  %v73_v6 = vlaneseq  ;;  %s1183_s8 = smov 96   ;;  %vm306_vm1 = vcmask 130048  }
   0x5   :  { %1008 = vmatpush3.msra.mxu0 %v27_v1  ;;  %v1249_v9 = vld [vmem:[%s1477_s3] sm:$0xff]  ;;  %v58_v19 = vld [vmem:[%s1478_s4 + $0x10] sm:$0xff]  ;;  %v66_v33 = vld [vmem:[%s1478_s4 + $0x18] sm:$0xff]  ;;  %vm781_vm2 = vcmask 523264  }
   0x6   :  { %1009 = vmatprep.subr.mxu0 %v26_v3  ;;  %v1243_v7 = vshrl.u32 %v73_v6, 7  ;;  %v57_v14 = vld [vmem:[%s1478_s4] sm:$0xff]  ;;  %v60_v23 = vld [vmem:[%s1478_s4 + $0x30] sm:$0xff]  ;;  %v65_v35 = vld [vmem:[%s1478_s4 + $0x8] sm:$0xff] }
   0x7   :  { %1010 = vmatpush3.msra.mxu0 %v26_v3  ;;  %v59_v20 = vld [vmem:[%s1478_s4 + $0x20] sm:$0xff]  ;;  %v62_v27 = vld [vmem:[%s1478_s4 + $0x50] sm:$0xff]  ;;  %v68_v40 = vld [vmem:[%s1478_s4 + $0x38] sm:$0xff] }
   0x8   :  { %1011 = vmatprep.subr.mxu0 %v25_v4  ;;  %v75_v8 = vsub.s32 0, %v1243_v7  ;;  %v61_v24 = vld [vmem:[%s1478_s4 + $0x40] sm:$0xff]  ;;  %v64_v31 = vld [vmem:[%s1478_s4 + $0x70] sm:$0xff]  ;;  %v67_v42 = vld [vmem:[%s1478_s4 + $0x28] sm:$0xff] }
   0x9   :  { %1012 = vmatpush3.msra.mxu0 %v25_v4  ;;  %v63_v28 = vld [vmem:[%s1478_s4 + $0x60] sm:$0xff]  ;;  %v70_v47 = vld [vmem:[%s1478_s4 + $0x58] sm:$0xff]  ;;  %v69_v53 = vld [vmem:[%s1478_s4 + $0x48] sm:$0xff] }
   0xa   :  { %1014 = vmatmul.mubr.msk.f32.vlgmr.msra.gmra.mxu0 %vm77_vm0, %v1239_v5  ;;  %v76_v10 = vrot.slane %v1249_v9, %v75_v8  ;;  %v71_v58 = vld [vmem:[%s1478_s4 + $0x68] sm:$0xff]  ;;  %v72_v61 = vld [vmem:[%s1478_s4 + $0x78] sm:$0xff] }
  0xca   :  { %v1015_v11 = vpop.f32.mrf.mxu0 }
  0xcb   :  { %v156_v12 = vadd.f32 %v1015_v11, %v76_v10 }
  0xcc   :  { %v150_v13 = vpop.f32.mrf.mxu0 }
  0xcd   :  { %v151_v15 = vadd.f32 %v150_v13, %v76_v10  ;;  %171 = vrot.lane.b32.xlu0 %v156_v12, %s1183_s8  ;;  %1032 = vmatprep.subr.mxu0 %v156_v12  ;;  %v160_v21 = vmul.f32 %v156_v12, %v58_v19  ;;  %v162_v25 = vmul.f32 %v156_v12, %v60_v23 }
  0xce   :  { %1033 = vmatpush3.msra.mxu0 %v156_v12  ;;  %v164_v29 = vmul.f32 %v156_v12, %v62_v27  ;;  %v166_v32 = vmul.f32 %v156_v12, %v64_v31 }
  0xcf   :  { %1034 = vmatprep.subr.mxu0 %v151_v15  ;;  %v159_v16 = vmul.f32 %v151_v15, %v57_v14  ;;  %v161_v22 = vmul.f32 %v151_v15, %v59_v20  ;;  %v163_v26 = vmul.f32 %v151_v15, %v61_v24  ;;  %v165_v30 = vmul.f32 %v151_v15, %v63_v28 }
  0xd0   :  { %1035 = vmatpush3.msra.mxu0 %v151_v15 }
  0xd1   :  { %169 = vrot.lane.b32.xlu0 %v151_v15, %s1183_s8  ;;  %1020 = vmatprep.mubr.msk.f32.mxu1 %vm77_vm0, %v159_v16 }
 0x13f   :  { %v172_v17 = vpop.permute.xlu0 %171 }
 0x140   :  { %1016 = vmatprep.subr.msk.mxu1 %vm77_vm0, %v172_v17 }
 0x141   :  { %1017 = vmatpush3.xpose.msk.msra.mxu1 %vm77_vm0, %v172_v17 }
 0x143   :  { %v170_v18 = vpop.permute.xlu0 %169 }
 0x144   :  { %1018 = vmatprep.subr.msk.mxu1 %vm77_vm0, %v170_v18 }
 0x145   :  { %1019 = vmatpush3.xpose.msk.msra.mxu1 %vm77_vm0, %v170_v18 }
 0x148   :  { %1021 = vmatmul.mubr.msk.f32.vlgmr.msra.gmra.mxu1 %vm77_vm0, %v160_v21 }
 0x149   :  { %1023 = vmatprep.mubr.msk.f32.mxu1 %vm77_vm0, %v161_v22 }
 0x14c   :  { %1024 = vmatmul.mubr.msk.f32.gmra.mxu1 %vm77_vm0, %v162_v25 }
 0x14d   :  { %1026 = vmatprep.mubr.msk.f32.mxu1 %vm77_vm0, %v163_v26 }
 0x150   :  { %1027 = vmatmul.mubr.msk.f32.gmra.mxu1 %vm77_vm0, %v164_v29 }
 0x151   :  { %1029 = vmatprep.mubr.msk.f32.mxu1 %vm77_vm0, %v165_v30 }
 0x154   :  { %1030 = vmatmul.mubr.msk.f32.gmra.mxu1 %vm77_vm0, %v166_v32 }
 0x208   :  { %v1022_v34 = vpop.f32.mrf.mxu1 }
 0x209   :  { %v273_v36 = vadd.f32 %v1022_v34, %v66_v33 }
 0x20a   :  { %v267_v37 = vpop.f32.mrf.mxu1 }
 0x20b   :  { %v268_v38 = vadd.f32 %v267_v37, %v65_v35  ;;  %v310_v39 = vsel %vm306_vm1, %v273_v36, -inf }
 0x20c   :  { %311 = vmax.xlane.f32.xlu1 %v310_v39  ;;  %v1025_v41 = vpop.f32.mrf.mxu1 }
 0x20d   :  { %v283_v44 = vadd.f32 %v1025_v41, %v68_v40  ;;  %v307_v46 = vsel %vm306_vm1, %v268_v38, -inf }
 0x20e   :  { %v277_v43 = vpop.f32.mrf.mxu1 }
 0x20f   :  { %v278_v45 = vadd.f32 %v277_v43, %v67_v42  ;;  %v316_v52 = vsel %vm306_vm1, %v283_v44, -inf }
 0x210   :  { %v1028_v48 = vpop.f32.mrf.mxu1  ;;  %308 = vmax.xlane.f32.xlu1 %v307_v46  ;;  %v48_v46 = vld [vmem:[%s1476_s2 + $0x78] sm:$0xff] }
 0x211   :  { %v313_v49 = vsel %vm306_vm1, %v278_v45, -inf  ;;  %v293_v51 = vadd.f32 %v1028_v48, %v70_v47  ;;  %v47_v47 = vld [vmem:[%s1476_s2 + $0x70] sm:$0xff]  ;;  %1048 = vmatprep.subr.mxu1 %v48_v46  ;;  %v46_v48 = vld [vmem:[%s1476_s2 + $0x68] sm:$0xff] }
 0x212   :  { %v287_v50 = vpop.f32.mrf.mxu1  ;;  %314 = vmax.xlane.f32.xlu0 %v313_v49  ;;  %1049 = vmatpush3.msra.mxu1 %v48_v46 }
 0x213   :  { %v288_v55 = vadd.f32 %v287_v50, %v69_v53  ;;  %v322_v56 = vsel %vm306_vm1, %v293_v51, -inf  ;;  %1050 = vmatprep.subr.mxu1 %v47_v47 }
 0x214   :  { %v1031_v54 = vpop.f32.mrf.mxu1  ;;  %317 = vmax.xlane.f32.xlu1 %v316_v52  ;;  %1051 = vmatpush3.msra.mxu1 %v47_v47 }
 0x215   :  { %v319_v60 = vsel %vm306_vm1, %v288_v55, -inf  ;;  %v303_v62 = vadd.f32 %v1031_v54, %v72_v61  ;;  %1052 = vmatprep.subr.mxu1 %v46_v48 }
 0x216   :  { %v297_v57 = vpop.f32.mrf.mxu1  ;;  %1053 = vmatpush3.msra.mxu1 %v46_v48 }
 0x217   :  { %v298_v59 = vadd.f32 %v297_v57, %v71_v58  ;;  %v328_v0 = vsel %vm306_vm1, %v303_v62, -inf }
 0x218   :  { %323 = vmax.xlane.f32.xlu1 %v322_v56 }
 0x219   :  { %v325_v63 = vsel %vm306_vm1, %v298_v59, -inf }
 0x21c   :  { %320 = vmax.xlane.f32.xlu1 %v319_v60 }
 0x220   :  { %326 = vmax.xlane.f32.xlu1 %v325_v63 }
 0x224   :  { %329 = vmax.xlane.f32.xlu1 %v328_v0 }
 0x295   :  { %v312_v1 = vpop.xlane.xlu1 %311 }
 0x296   :  { %v332_v3 = vsub.f32 %v273_v36, %v312_v1 }
 0x298   :  { %v341_v4 = vmul.f32 1.442695, %v332_v3 }
 0x299   :  { %v309_v6 = vpop.xlane.xlu1 %308 }
 0x29a   :  { %1117 = vpow2.f32 %v341_v4  ;;  %v331_v10 = vsub.f32 %v268_v38, %v309_v6 }
 0x29b   :  { %v315_v11 = vpop.xlane.xlu0 %314 }
 0x29c   :  { %v339_v12 = vmul.f32 1.442695, %v331_v10  ;;  %v333_v13 = vsub.f32 %v278_v45, %v315_v11 }
 0x29d   :  { %v318_v14 = vpop.xlane.xlu1 %317 }
 0x29e   :  { %1119 = vpow2.f32 %v339_v12  ;;  %v343_v15 = vmul.f32 1.442695, %v333_v13  ;;  %v334_v16 = vsub.f32 %v283_v44, %v318_v14  ;;  %v45_v14 = vld [vmem:[%s1476_s2 + $0x60] sm:$0xff] }
 0x29f   :  { %1054 = vmatprep.subr.mxu1 %v45_v14 }
 0x2a0   :  { %1121 = vpow2.f32 %v343_v15  ;;  %v345_v17 = vmul.f32 1.442695, %v334_v16  ;;  %1055 = vmatpush3.msra.mxu1 %v45_v14  ;;  %v44_v15 = vld [vmem:[%s1476_s2 + $0x58] sm:$0xff]  ;;  %v43_v16 = vld [vmem:[%s1476_s2 + $0x50] sm:$0xff] }
 0x2a1   :  { %v324_v18 = vpop.xlane.xlu1 %323  ;;  %1056 = vmatprep.subr.mxu1 %v44_v15 }
 0x2a2   :  { %1123 = vpow2.f32 %v345_v17  ;;  %v336_v19 = vsub.f32 %v293_v51, %v324_v18  ;;  %1057 = vmatpush3.msra.mxu1 %v44_v15  ;;  %v42_v17 = vld [vmem:[%s1476_s2 + $0x48] sm:$0xff]  ;;  %v41_v18 = vld [vmem:[%s1476_s2 + $0x40] sm:$0xff] }
 0x2a3   :  { %1058 = vmatprep.subr.mxu1 %v43_v16  ;;  %v31_v15 = vld [vmem:[%s1475_s1 + $0x28] sm:$0xff] }
 0x2a4   :  { %v349_v20 = vmul.f32 1.442695, %v336_v19  ;;  %1059 = vmatpush3.msra.mxu1 %v43_v16  ;;  %v40_v19 = vld [vmem:[%s1476_s2 + $0x38] sm:$0xff] }
 0x2a5   :  { %v321_v21 = vpop.xlane.xlu1 %320  ;;  %1060 = vmatprep.subr.mxu1 %v42_v17  ;;  %v30_v16 = vld [vmem:[%s1475_s1 + $0x18] sm:$0xff] }
 0x2a6   :  { %1125 = vpow2.f32 %v349_v20  ;;  %v335_v22 = vsub.f32 %v288_v55, %v321_v21  ;;  %1061 = vmatpush3.msra.mxu1 %v42_v17  ;;  %v39_v20 = vld [vmem:[%s1476_s2 + $0x30] sm:$0xff]  ;;  %v38_v21 = vld [vmem:[%s1476_s2 + $0x28] sm:$0xff] }
 0x2a7   :  { %v1118_v23 = vpop.eup %1117  ;;  %1062 = vmatprep.subr.mxu1 %v41_v18  ;;  %v29_v17 = vld [vmem:[%s1475_s1 + $0x8] sm:$0xff] }
 0x2a8   :  { %v347_v24 = vmul.f32 1.442695, %v335_v22  ;;  %v358_v25 = vsel %vm306_vm1, %v1118_v23, 0.0  ;;  %1063 = vmatpush3.msra.mxu1 %v41_v18  ;;  %v37_v22 = vld [vmem:[%s1476_s2 + $0x20] sm:$0xff] }
 0x2a9   :  { %359 = vadd.xlane.f32.xlu1 %v358_v25  ;;  %v327_v26 = vpop.xlane.xlu1 %326  ;;  %1064 = vmatprep.subr.mxu1 %v40_v19  ;;  %v34_v25 = vld [vmem:[%s1476_s2 + $0x8] sm:$0xff] }
 0x2aa   :  { %1127 = vpow2.f32 %v347_v24  ;;  %v337_v27 = vsub.f32 %v298_v59, %v327_v26  ;;  %1065 = vmatpush3.msra.mxu1 %v40_v19  ;;  %v35_v24 = vld [vmem:[%s1476_s2 + $0x10] sm:$0xff]  ;;  %v33_v26 = vld [vmem:[%s1476_s2] sm:$0xff] }
 0x2ab   :  { %v1120_v28 = vpop.eup %1119  ;;  %1066 = vmatprep.subr.mxu1 %v39_v20 }
 0x2ac   :  { %v351_v29 = vmul.f32 1.442695, %v337_v27  ;;  %v355_v30 = vsel %vm306_vm1, %v1120_v28, 0.0  ;;  %1067 = vmatpush3.msra.mxu1 %v39_v20 }
 0x2ad   :  { %v1122_v31 = vpop.eup %1121  ;;  %356 = vadd.xlane.f32.xlu1 %v355_v30  ;;  %v330_v32 = vpop.xlane.xlu1 %329  ;;  %1068 = vmatprep.subr.mxu1 %v38_v21  ;;  %v532_v30 = vsub.s32 1, %v1243_v7 }
 0x2ae   :  { %1129 = vpow2.f32 %v351_v29  ;;  %v338_v33 = vsub.f32 %v303_v62, %v330_v32  ;;  %v361_v36 = vsel %vm306_vm1, %v1122_v31, 0.0  ;;  %1069 = vmatpush3.msra.mxu1 %v38_v21  ;;  %v540_v32 = vsub.s32 2, %v1243_v7 }
 0x2af   :  { %v1124_v34 = vpop.eup %1123  ;;  %1070 = vmatprep.subr.mxu1 %v37_v22 }
 0x2b0   :  { %v353_v35 = vmul.f32 1.442695, %v338_v33  ;;  %v364_v37 = vsel %vm306_vm1, %v1124_v34, 0.0  ;;  %1071 = vmatpush3.msra.mxu1 %v37_v22  ;;  %v24_v33 = vld [vmem:[%s1477_s3 + $0x8] sm:$0xff] }
 0x2b1   :  { %362 = vadd.xlane.f32.xlu1 %v361_v36  ;;  %365 = vadd.xlane.f32.xlu0 %v364_v37  ;;  %v548_v36 = vsub.s32 3, %v1243_v7  ;;  %v527_v37 = vrot.slane %v24_v33, %v75_v8 }
 0x2b2   :  { %1131 = vpow2.f32 %v353_v35  ;;  %v533_v35 = vrot.slane %v24_v33, %v532_v30 }
 0x2b3   :  { %v1126_v38 = vpop.eup %1125 }
 0x2b4   :  { %v370_v39 = vsel %vm306_vm1, %v1126_v38, 0.0 }
 0x2b5   :  { %371 = vadd.xlane.f32.xlu0 %v370_v39 }
 0x2b7   :  { %v1128_v40 = vpop.eup %1127 }
 0x2b8   :  { %v367_v41 = vsel %vm306_vm1, %v1128_v40, 0.0 }
 0x2b9   :  { %368 = vadd.xlane.f32.xlu1 %v367_v41 }
 0x2bb   :  { %v1130_v42 = vpop.eup %1129 }
 0x2bc   :  { %v373_v43 = vsel %vm306_vm1, %v1130_v42, 0.0 }
 0x2bd   :  { %374 = vadd.xlane.f32.xlu1 %v373_v43 }
 0x2bf   :  { %v1132_v44 = vpop.eup %1131 }
 0x2c0   :  { %v376_v45 = vsel %vm306_vm1, %v1132_v44, 0.0 }
 0x2c1   :  { %377 = vadd.xlane.f32.xlu0 %v376_v45 }
 0x332   :  { %v360_v49 = vpop.xlane.xlu1 %359 }
 0x333   :  { %1133 = vrcp.f32 %v360_v49 }
 0x336   :  { %v357_v50 = vpop.xlane.xlu1 %356 }
 0x337   :  { %1135 = vrcp.f32 %v357_v50 }
 0x33a   :  { %v366_v51 = vpop.xlane.xlu0 %365  ;;  %v363_v52 = vpop.xlane.xlu1 %362 }
 0x33b   :  { %1137 = vrcp.f32 %v366_v51 }
 0x33c   :  { %1139 = vrcp.f32 %v363_v52 }
 0x33e   :  { %v372_v53 = vpop.xlane.xlu0 %371 }
 0x33f   :  { %1141 = vrcp.f32 %v372_v53 }
 0x340   :  { %v1134_v55 = vpop.eup %1133 }
 0x341   :  { %v382_v59 = vmul.f32 %v1134_v55, %v1118_v23  ;;  %v36_v23 = vld [vmem:[%s1476_s2 + $0x18] sm:$0xff] }
 0x342   :  { %v369_v54 = vpop.xlane.xlu1 %368  ;;  %1072 = vmatprep.subr.mxu1 %v36_v23 }
 0x343   :  { %1143 = vrcp.f32 %v369_v54  ;;  %1073 = vmatpush3.msra.mxu1 %v36_v23 }
 0x344   :  { %v1136_v56 = vpop.eup %1135  ;;  %1074 = vmatprep.subr.mxu1 %v35_v24 }
 0x345   :  { %v380_v57 = vmul.f32 %v1136_v56, %v1120_v28  ;;  %1075 = vmatpush3.msra.mxu1 %v35_v24  ;;  %v557_v56 = vrot.slane %v1249_v9, %v532_v30  ;;  %v665_v24 = vrot.slane %v1249_v9, %v540_v32 }
 0x346   :  { %v375_v58 = vpop.xlane.xlu1 %374  ;;  %1076 = vmatprep.subr.mxu1 %v34_v25 }
 0x347   :  { %1145 = vrcp.f32 %v375_v58  ;;  %1036 = vmatprep.mubr.msk.f32.mxu0 %vm306_vm1, %v380_v57  ;;  %1077 = vmatpush3.msra.mxu1 %v34_v25 }
 0x348   :  { %v1138_v60 = vpop.eup %1137  ;;  %1037 = vmatmul.mubr.msk.f32.vlgmr.msra.gmra.mxu0 %vm306_vm1, %v382_v59  ;;  %1078 = vmatprep.subr.mxu1 %v33_v26 }
 0x349   :  { %v1140_v61 = vpop.eup %1139  ;;  %v386_v62 = vmul.f32 %v1138_v60, %v1124_v34  ;;  %1079 = vmatpush3.msra.mxu1 %v33_v26  ;;  %v671_v26 = vrot.slane %v1249_v9, %v548_v36 }
 0x34a   :  { %v378_v63 = vpop.xlane.xlu0 %377  ;;  %v384_v0 = vmul.f32 %v1140_v61, %v1122_v31 }
 0x34b   :  { %1147 = vrcp.f32 %v378_v63 }
 0x34c   :  { %1039 = vmatprep.mubr.msk.f32.mxu0 %vm306_vm1, %v384_v0  ;;  %v1142_v1 = vpop.eup %1141 }
 0x34d   :  { %1040 = vmatmul.mubr.msk.f32.gmra.mxu0 %vm306_vm1, %v386_v62  ;;  %v390_v6 = vmul.f32 %v1142_v1, %v1126_v38  ;;  %v541_v38 = vrot.slane %v24_v33, %v540_v32  ;;  %v56_v32 = vld [vmem:[%s1476_s2 + $0xb8] sm:$0xff] }
 0x350   :  { %v1144_v3 = vpop.eup %1143 }
 0x351   :  { %v388_v4 = vmul.f32 %v1144_v3, %v1128_v40 }
 0x353   :  { %1042 = vmatprep.mubr.msk.f32.mxu0 %vm306_vm1, %v388_v4 }
 0x354   :  { %v1146_v10 = vpop.eup %1145  ;;  %1043 = vmatmul.mubr.msk.f32.gmra.mxu0 %vm306_vm1, %v390_v6 }
 0x355   :  { %v392_v11 = vmul.f32 %v1146_v10, %v1130_v42  ;;  %v549_v42 = vrot.slane %v24_v33, %v548_v36  ;;  %v54_v36 = vld [vmem:[%s1476_s2 + $0xa8] sm:$0xff] }
 0x357   :  { %1045 = vmatprep.mubr.msk.f32.mxu0 %vm306_vm1, %v392_v11 }
 0x358   :  { %v1148_v12 = vpop.eup %1147 }
 0x359   :  { %v394_v13 = vmul.f32 %v1148_v12, %v1132_v44 }
 0x35b   :  { %1046 = vmatmul.mubr.msk.f32.gmra.mxu0 %vm306_vm1, %v394_v13 }
 0x408   :  { %v1038_v27 = vpop.f32.mrf.mxu0 }
 0x409   :  { %v529_v45 = vmul.f32 %v1038_v27, %v527_v37 }
 0x40a   :  { %v485_v28 = vpop.f32.mrf.mxu0 }
 0x40b   :  { %v528_v43 = vmul.f32 %v527_v37, %v485_v28  ;;  %v53_v37 = vld [vmem:[%s1476_s2 + $0xa0] sm:$0xff] }
 0x40d   :  { %v1041_v29 = vpop.f32.mrf.mxu0 }
 0x40e   :  { %v535_v41 = vmul.f32 %v1041_v29, %v533_v35 }
 0x40f   :  { %v495_v31 = vpop.f32.mrf.mxu0 }
 0x410   :  { %v534_v40 = vmul.f32 %v533_v35, %v495_v31  ;;  %v537_v49 = vadd.f32 %v535_v41, %v529_v45  ;;  %v55_v35 = vld [vmem:[%s1476_s2 + $0xb0] sm:$0xff]  ;;  %v49_v41 = vld [vmem:[%s1476_s2 + $0x80] sm:$0xff] }
 0x412   :  { %v536_v48 = vadd.f32 %v534_v40, %v528_v43  ;;  %v50_v40 = vld [vmem:[%s1476_s2 + $0x88] sm:$0xff] }
 0x414   :  { %v1044_v34 = vpop.f32.mrf.mxu0 }
 0x415   :  { %v543_v46 = vmul.f32 %v1044_v34, %v541_v38 }
 0x416   :  { %v505_v39 = vpop.f32.mrf.mxu0 }
 0x417   :  { %v542_v44 = vmul.f32 %v541_v38, %v505_v39  ;;  %v545_v53 = vadd.f32 %v543_v46, %v537_v49  ;;  %v52_v38 = vld [vmem:[%s1476_s2 + $0x98] sm:$0xff]  ;;  %v51_v39 = vld [vmem:[%s1476_s2 + $0x90] sm:$0xff]  ;;  %s1184_s2 = smov [#allocation2]  }
 0x418   :  { %s910_s14 = sshll.u32 %s1184_s2, 4  ;;  %s911_s14 = int_to_ptr.vmem [resolvable:$true] %s910_s14 }
 0x419   :  { %v544_v52 = vadd.f32 %v542_v44, %v536_v48  ;;  %s1161_s15 = scalar_lea.vmem %s911_s14, 256  ;;  %p1166_p1 = scmp.lt.s32.totalorder %s911_s14, %s911_s14 }
 0x41a   :  { %p1162_p0 = scmp.ne.s32.totalorder %s911_s14, %s1161_s15  ;;  %p1167_p2 = scmp.lt.s32.totalorder %s1161_s15, %s1161_s15 }
 0x41b   :  { %v1047_v47 = vpop.f32.mrf.mxu0 }
 0x41c   :  { %v551_v50 = vmul.f32 %v1047_v47, %v549_v42  ;;  %p1168_p3 = por %p1167_p2, %p1166_p1 }
 0x41d   :  { %v515_v51 = vpop.f32.mrf.mxu0 }
 0x41e   :  { %v550_v8 = vmul.f32 %v549_v42, %v515_v51  ;;  %v553_v55 = vadd.f32 %v551_v50, %v545_v53  ;;  %v676_v42 = vsub.s32 4, %v1243_v7  ;;  %p1169_p4 = pnand %p1168_p3, %p1162_p0 }
 0x420   :  { %v552_v54 = vadd.f32 %v550_v8, %v544_v52  ;;  %v677_v43 = vrot.slane %v1249_v9, %v676_v42 }
 0x422   :  { %1080 = vmatprep.mubr.f32.mxu1 %v552_v54 }
 0x423   :  { %1081 = vmatmul.mubr.f32.vlgmr.msra.gmra.mxu1 %v553_v55 }
 0x4e3   :  { %v1082_v57 = vpop.f32.mrf.mxu1 }
 0x4e4   :  { %v630_v58 = vadd.f32 %v1082_v57, %v557_v56 }
 0x4e5   :  { %v624_v59 = vpop.f32.mrf.mxu1 }
 0x4e6   :  { %v625_v60 = vadd.f32 %v624_v59, %v557_v56  ;;  %v634_v61 = vadd.f32 %v630_v58, %v1239_v5 }
 0x4e8   :  { %v638_v62 = vsel %vm77_vm0, %v634_v61, 0.0  ;;  %v633_v63 = vadd.f32 %v625_v60, %v1226_v2  ;;  %v32_v2 = vld [vmem:[%s1475_s1 + $0x38] sm:$0xff] }
 0x4e9   :  { %639 = vadd.xlane.f32.xlu0 %v638_v62  ;;  %1083 = vmatprep.subr.mxu0 %v32_v2 }
 0x4ea   :  { %v635_v0 = vsel %vm77_vm0, %v633_v63, 0.0  ;;  %1084 = vmatpush3.msra.mxu0 %v32_v2 }
 0x4eb   :  { %636 = vadd.xlane.f32.xlu1 %v635_v0  ;;  %1085 = vmatprep.subr.mxu0 %v31_v15 }
 0x4ec   :  { %1086 = vmatpush3.msra.mxu0 %v31_v15 }
 0x4ed   :  { %1087 = vmatprep.subr.mxu0 %v30_v16 }
 0x4ee   :  { %1088 = vmatpush3.msra.mxu0 %v30_v16 }
 0x4ef   :  { %1089 = vmatprep.subr.mxu0 %v29_v17 }
 0x4f0   :  { %1090 = vmatpush3.msra.mxu0 %v29_v17 }
 0x4f1   :  { %1094 = vmatprep.subr.mxu0 %v56_v32 }
 0x572   :  { %v640_v1 = vpop.xlane.xlu0 %639 }
 0x573   :  { %v643_v3 = vmul.f32 0.03125, %v640_v1  ;;  %v779_v1 = vsub.s32 5, %v1243_v7 }
 0x574   :  { %v637_v4 = vpop.xlane.xlu1 %636 }
 0x575   :  { %v645_v6 = vsub.f32 %v634_v61, %v643_v3  ;;  %v642_v10 = vmul.f32 0.03125, %v637_v4  ;;  %v780_v3 = vrot.slane %v1249_v9, %v779_v1 }
 0x577   :  { %v644_v11 = vsub.f32 %v633_v63, %v642_v10  ;;  %v647_v12 = vmul.f32 %v645_v6, %v645_v6 }
 0x579   :  { %v651_v13 = vsel %vm77_vm0, %v647_v12, 0.0  ;;  %v646_v14 = vmul.f32 %v644_v11, %v644_v11 }
 0x57a   :  { %652 = vadd.xlane.f32.xlu0 %v651_v13 }
 0x57b   :  { %v648_v5 = vsel %vm77_vm0, %v646_v14, 0.0 }
 0x57c   :  { %649 = vadd.xlane.f32.xlu1 %v648_v5 }
 0x603   :  { %v653_v18 = vpop.xlane.xlu0 %652 }
 0x604   :  { %v655_v19 = vmul.f32 0.03125, %v653_v18 }
 0x605   :  { %v650_v20 = vpop.xlane.xlu1 %649 }
 0x606   :  { %v657_v21 = vadd.f32 1e-12, %v655_v19  ;;  %v654_v22 = vmul.f32 0.03125, %v650_v20 }
 0x608   :  { %1149 = vrsqrt.f32 %v657_v21  ;;  %v656_v23 = vadd.f32 1e-12, %v654_v22 }
 0x60a   :  { %1151 = vrsqrt.f32 %v656_v23 }
 0x615   :  { %v1150_v25 = vpop.eup %1149 }
 0x616   :  { %v661_v27 = vmul.f32 %v1150_v25, %v645_v6 }
 0x617   :  { %v1152_v28 = vpop.eup %1151 }
 0x618   :  { %v667_v29 = vmul.f32 %v665_v24, %v661_v27  ;;  %v660_v30 = vmul.f32 %v1152_v28, %v644_v11 }
 0x61a   :  { %v666_v31 = vmul.f32 %v665_v24, %v660_v30  ;;  %v1423_v33 = vadd.f32 %v671_v26, %v667_v29  ;;  %v893_v30 = vsub.s32 6, %v1243_v7 }
 0x61c   :  { %v1425_v34 = vadd.f32 %v671_v26, %v666_v31  ;;  %v899_v31 = vsub.s32 7, %v1243_v7 }
 0x61e   :  { %1091 = vmatprep.mubr.msk.f32.mxu0 %vm77_vm0, %v1425_v34 }
 0x61f   :  { %1092 = vmatmul.mubr.msk.f32.vlgmr.msra.gmra.mxu0 %vm77_vm0, %v1423_v33 }
 0x620   :  { %1095 = vmatpush3.msra.mxu0 %v56_v32 }
 0x621   :  { %1096 = vmatprep.subr.mxu0 %v55_v35 }
 0x622   :  { %1097 = vmatpush3.msra.mxu0 %v55_v35  ;;  %v900_v35 = vrot.slane %v1249_v9, %v899_v31 }
 0x623   :  { %1098 = vmatprep.subr.mxu0 %v54_v36 }
 0x624   :  { %1099 = vmatpush3.msra.mxu0 %v54_v36 }
 0x625   :  { %1100 = vmatprep.subr.mxu0 %v53_v37 }
 0x626   :  { %1101 = vmatpush3.msra.mxu0 %v53_v37 }
 0x627   :  { %1102 = vmatprep.subr.mxu0 %v52_v38 }
 0x628   :  { %1103 = vmatpush3.msra.mxu0 %v52_v38 }
 0x629   :  { %1104 = vmatprep.subr.mxu0 %v51_v39 }
 0x62a   :  { %1105 = vmatpush3.msra.mxu0 %v51_v39 }
 0x62b   :  { %1106 = vmatprep.subr.mxu0 %v50_v40 }
 0x62c   :  { %1107 = vmatpush3.msra.mxu0 %v50_v40 }
 0x62d   :  { %1108 = vmatprep.subr.mxu0 %v49_v41 }
 0x62e   :  { %1109 = vmatpush3.msra.mxu0 %v49_v41 }
 0x6df   :  { %v1093_v44 = vpop.f32.mrf.mxu0 }
 0x6e0   :  { %v756_v45 = vadd.f32 %v1093_v44, %v677_v43 }
 0x6e1   :  { %v750_v46 = vpop.f32.mrf.mxu0 }
 0x6e2   :  { %v760_v47 = vmul.f32 %v756_v45, %v756_v45  ;;  %v751_v48 = vadd.f32 %v750_v46, %v677_v43 }
 0x6e4   :  { %v762_v49 = vmul.f32 %v760_v47, %v756_v45  ;;  %v759_v50 = vmul.f32 %v751_v48, %v751_v48 }
 0x6e6   :  { %v764_v51 = vmul.f32 0.044715, %v762_v49  ;;  %v761_v52 = vmul.f32 %v759_v50, %v751_v48 }
 0x6e8   :  { %v766_v8 = vadd.f32 %v764_v51, %v756_v45  ;;  %v763_v53 = vmul.f32 0.044715, %v761_v52 }
 0x6ea   :  { %v768_v54 = vmul.f32 0.7978846, %v766_v8  ;;  %v765_v55 = vadd.f32 %v763_v53, %v751_v48 }
 0x6ec   :  { %1153 = vtanh.f32 %v768_v54  ;;  %v767_v56 = vmul.f32 0.7978846, %v765_v55 }
 0x6ee   :  { %1155 = vtanh.f32 %v767_v56 }
 0x6f9   :  { %v1154_v57 = vpop.eup %1153 }
 0x6fa   :  { %v772_v58 = vadd.f32 1.0, %v1154_v57 }
 0x6fb   :  { %v1156_v59 = vpop.eup %1155 }
 0x6fc   :  { %v771_v60 = vadd.f32 1.0, %v1156_v59  ;;  %v774_v61 = vmul.f32 0.5, %v772_v58 }
 0x6fe   :  { %v773_v62 = vmul.f32 0.5, %v771_v60  ;;  %v776_v0 = vmul.f32 %v774_v61, %v756_v45 }
 0x700   :  { %v775_v63 = vmul.f32 %v773_v62, %v751_v48 }
 0x702   :  { %1110 = vmatprep.mubr.msk.f32.mxu0 %vm781_vm2, %v775_v63 }
 0x703   :  { %1111 = vmatmul.mubr.msk.f32.vlgmr.msra.gmra.mxu0 %vm781_vm2, %v776_v0 }
 0x7c3   :  { %v1112_v4 = vpop.f32.mrf.mxu0 }
 0x7c4   :  { %v860_v6 = vadd.f32 %v1112_v4, %v780_v3 }
 0x7c5   :  { %v854_v10 = vpop.f32.mrf.mxu0 }
 0x7c6   :  { %v855_v11 = vadd.f32 %v854_v10, %v780_v3  ;;  %v864_v12 = vadd.f32 %v860_v6, %v1423_v33  ;;  %v894_v33 = vrot.slane %v1249_v9, %v893_v30 }
 0x7c8   :  { %v868_v13 = vsel %vm77_vm0, %v864_v12, 0.0  ;;  %v863_v14 = vadd.f32 %v855_v11, %v1425_v34 }
 0x7c9   :  { %869 = vadd.xlane.f32.xlu0 %v868_v13 }
 0x7ca   :  { %v865_v5 = vsel %vm77_vm0, %v863_v14, 0.0 }
 0x7cb   :  { %866 = vadd.xlane.f32.xlu1 %v865_v5 }
 0x852   :  { %v870_v2 = vpop.xlane.xlu0 %869 }
 0x853   :  { %v872_v15 = vmul.f32 0.03125, %v870_v2 }
 0x854   :  { %v867_v16 = vpop.xlane.xlu1 %866 }
 0x855   :  { %v874_v17 = vsub.f32 %v864_v12, %v872_v15  ;;  %v871_v18 = vmul.f32 0.03125, %v867_v16 }
 0x857   :  { %v873_v19 = vsub.f32 %v863_v14, %v871_v18  ;;  %v876_v20 = vmul.f32 %v874_v17, %v874_v17 }
 0x859   :  { %v880_v21 = vsel %vm77_vm0, %v876_v20, 0.0  ;;  %v875_v22 = vmul.f32 %v873_v19, %v873_v19 }
 0x85a   :  { %881 = vadd.xlane.f32.xlu0 %v880_v21 }
 0x85b   :  { %v877_v23 = vsel %vm77_vm0, %v875_v22, 0.0 }
 0x85c   :  { %878 = vadd.xlane.f32.xlu1 %v877_v23 }
 0x8e3   :  { %v882_v24 = vpop.xlane.xlu0 %881 }
 0x8e4   :  { %v884_v25 = vmul.f32 0.03125, %v882_v24 }
 0x8e5   :  { %v879_v26 = vpop.xlane.xlu1 %878 }
 0x8e6   :  { %v886_v27 = vadd.f32 1e-12, %v884_v25  ;;  %v883_v28 = vmul.f32 0.03125, %v879_v26 }
 0x8e8   :  { %1157 = vrsqrt.f32 %v886_v27  ;;  %v885_v29 = vadd.f32 1e-12, %v883_v28 }
 0x8ea   :  { %1159 = vrsqrt.f32 %v885_v29 }
 0x8f5   :  { %v1158_v34 = vpop.eup %1157 }
 0x8f6   :  { %v890_v32 = vmul.f32 %v1158_v34, %v874_v17 }
 0x8f7   :  { %v1160_v36 = vpop.eup %1159 }
 0x8f8   :  { %v889_v37 = vmul.f32 %v1160_v36, %v873_v19  ;;  %v896_v38 = vmul.f32 %v894_v33, %v890_v32 }
 0x8fa   :  { %v895_v39 = vmul.f32 %v894_v33, %v889_v37  ;;  %v902_v40 = vadd.f32 %v900_v35, %v896_v38 }
 0x8fc   :  { %v901_v41 = vadd.f32 %v900_v35, %v895_v39  ;;  %904 = vst.msk [vmem:[#allocation2 + $0x8] sm:$0xff] %vm77_vm0, %v902_v40 }
 0x8fe   :  { %903 = vst.msk [vmem:[#allocation2] sm:$0xff] %vm77_vm0, %v901_v41 }
 0x8ff   :  { %1172 = shalt.err (!%p1169_p4)
}
 0x900   :  { %s1185_s16 = smov 128   ;;  %s1186_s17 = smov 8  }
 0x901   :  { %916 = dma.vmem_to_hbm [thread:$0]  %s911_s14, 256, %s1479_s5, [#allocation3], %s1185_s16, %s1185_s16, %s1186_s17  }
 0x902   :  { %1181 = dma.done.wait [#allocation3], 256  }
 0x903   :  { %1182 = vsyncadd [#allocation3], 4294967040 }
 0x904   :  { %920 = vsyncpa [#allocation3], 1 }

</bundles_post_ra>
